<compile_context>
chip_gen: v5e
topology: v5e:2x2
jax: 0.10.0
libtpu: 0.0.40
codegen_flags: <defaults>
</compile_context>

<pallas_src>
import math

import jax
import jax.numpy as jnp
from jax.experimental import pallas as pl
from jax.experimental.pallas import tpu as pltpu

# ----------------------------- hyper-parameters ------------------------------
ENC_VOC_SIZE = 50
MAX_LEN = 8
D_MODEL = 32
FFN_HIDDEN = 64
N_HEAD = 4
N_LAYERS = 2
DROP_PROB = 0.1  # TODO(synk): dropout is identity at inference; train-mode dropout not implemented.

MXU_DTYPE = jnp.bfloat16  # matmul operand dtype (f32 accumulation)


# ------------------------------ Pallas kernel --------------------------------
def _make_encoder_kernel(rows, d_model, n_head, mxu_dtype):
    d_head = d_model // n_head
    scale = 1.0 / math.sqrt(d_head)
    eps = 1e-12

    def layer_norm(h, g, b):
        # fused single-pass statistics: var = E[x^2] - E[x]^2
        mu = jnp.mean(h, axis=-1, keepdims=True)
        m2 = jnp.mean(h * h, axis=-1, keepdims=True)
        var = m2 - mu * mu
        return g * (h - mu) * jax.lax.rsqrt(var + eps) + b

    def kernel(x_ref, keep_ref, hmask_ref, wqkv_ref, bqkv_ref, wo_ref,
               w1_ref, b1_ref, w2_ref, vec_ref, out_ref):
        l = pl.program_id(1)  # layer index (grid axis, "arbitrary")

        # first layer for this batch block: seed the residual stream
        @pl.when(l == 0)
        def _():
            out_ref[...] = x_ref[...]

        x = out_ref[...]                    # (rows, D) f32 residual stream
        keep = keep_ref[...] > 0.0          # (rows, rows) True = may attend
        hmask = hmask_ref[...]              # (H, 1, D) one-hot head-column mask

        vec = vec_ref[...]                  # (6, D): bo, b2, g1, be1, g2, be2
        bo, b2 = vec[0:1], vec[1:2]
        g1, be1 = vec[2:3], vec[3:4]
        g2, be2 = vec[4:5], vec[5:6]

        # ---- fused QKV projection: one (rows, D) x (D, 3D) MXU matmul -------
        qkv = jnp.dot(x.astype(mxu_dtype), wqkv_ref[...],
                      preferred_element_type=jnp.float32) + bqkv_ref[...]
        q = qkv[:, 0:d_model]
        k = qkv[:, d_model:2 * d_model]
        v = qkv[:, 2 * d_model:3 * d_model]

        # ---- per-head attention WITHOUT any head split/merge relayout -------
        # Head h is selected by zeroing every other column of K / V, so the
        # contraction over the full D equals the per-head d_head contraction
        # exactly, and the head merge is a plain sum over the head axis.
        q_b = jnp.broadcast_to(q.astype(mxu_dtype), (n_head, rows, d_model))
        k_m = (k[None] * hmask).astype(mxu_dtype)        # (H, rows, D)
        v_m = (v[None] * hmask).astype(mxu_dtype)        # (H, rows, D)

        s = jnp.einsum('hrd,htd->hrt', q_b, k_m,
                       preferred_element_type=jnp.float32) * scale  # (H, rows, rows)
        s = jnp.where(keep[None], s, -10000.0)           # == reference masked_fill
        p = jnp.exp(s)                                    # no max shift: logits O(1)
        p = p * pl.reciprocal(jnp.sum(p, axis=-1, keepdims=True), approx=True)
        o = jnp.einsum('hrt,htd->hrd', p.astype(mxu_dtype), v_m,
                       preferred_element_type=jnp.float32)
        o = jnp.sum(o, axis=0)                            # head merge (rows, D)

        attn = jnp.dot(o.astype(mxu_dtype), wo_ref[...],
                       preferred_element_type=jnp.float32) + bo

        # ---- add & norm 1 ----------------------------------------------------
        h1 = layer_norm(x + attn, g1, be1)

        # ---- position-wise feed forward: Linear -> ReLU -> Linear -----------
        f = jnp.dot(h1.astype(mxu_dtype), w1_ref[...],
                    preferred_element_type=jnp.float32) + b1_ref[...]
        f = jnp.maximum(f, 0.0)
        f = jnp.dot(f.astype(mxu_dtype), w2_ref[...],
                    preferred_element_type=jnp.float32) + b2

        # ---- add & norm 2 -> residual stream for the next layer grid step ---
        out_ref[...] = layer_norm(h1 + f, g2, be2).astype(out_ref.dtype)

    return kernel


# --------------------------- weight packing (glue) ----------------------------
def _pack_layer_params(layer_params):
    wqkv = jnp.stack([jnp.concatenate([lp["wq"], lp["wk"], lp["wv"]], axis=1)
                      for lp in layer_params]).astype(MXU_DTYPE)       # (L, D, 3D)
    bqkv = jnp.stack([jnp.concatenate([lp["bq"], lp["bk"], lp["bv"]], axis=1)
                      for lp in layer_params])                         # (L, 1, 3D)
    wo = jnp.stack([lp["wo"] for lp in layer_params]).astype(MXU_DTYPE)  # (L, D, D)
    w1 = jnp.stack([lp["w1"] for lp in layer_params]).astype(MXU_DTYPE)  # (L, D, F)
    b1 = jnp.stack([lp["b1"] for lp in layer_params])                    # (L, 1, F)
    w2 = jnp.stack([lp["w2"] for lp in layer_params]).astype(MXU_DTYPE)  # (L, F, D)
    vec = jnp.stack([jnp.concatenate([lp["bo"], lp["b2"], lp["g1"],
                                      lp["be1"], lp["g2"], lp["be2"]], axis=0)
                     for lp in layer_params])                            # (L, 6, D)
    return wqkv, bqkv, wo, w1, b1, w2, vec


def _head_mask(n_head, d_model):
    dh = d_model // n_head
    hm = (jnp.arange(d_model) // dh)[None, :] == jnp.arange(n_head)[:, None]
    return hm.astype(jnp.float32)[:, None, :]                            # (H, 1, D)


def _keep_mask(s_mask, batch_block, seq):
    """(nb, rows, rows) keep matrix: same batch element AND key not padded."""
    B = s_mask.shape[0]
    key_keep = s_mask.reshape(B, seq).astype(jnp.float32)
    nb = B // batch_block
    rows = batch_block * seq
    blocks = []
    for i in range(nb):
        kb = key_keep[i * batch_block:(i + 1) * batch_block]             # (bb, S)
        same = jnp.eye(batch_block, dtype=jnp.float32)                   # (bb, bb)
        kp = same[:, None, :, None] * kb[None, None, :, :]               # (bb,1,bb,S)
        kp = jnp.broadcast_to(kp, (batch_block, seq, batch_block, seq))
        blocks.append(kp.reshape(rows, rows))
    return jnp.stack(blocks, axis=0)


# ---------------------------- embedding (glue) --------------------------------
def sinusoid_encoding(max_len, d_model):
    pos = jnp.arange(max_len, dtype=jnp.float32)[:, None]
    _2i = jnp.arange(0, d_model, 2, dtype=jnp.float32)
    angle = pos / jnp.power(10000.0, _2i / d_model)
    enc = jnp.zeros((max_len, d_model), jnp.float32)
    enc = enc.at[:, 0::2].set(jnp.sin(angle))
    enc = enc.at[:, 1::2].set(jnp.cos(angle))
    return enc


# ------------------------------ full forward ----------------------------------
def encoder_forward(token_ids, s_mask, emb_table, layer_params, batch_block=None):
    B, S = token_ids.shape
    D, H, F = D_MODEL, N_HEAD, FFN_HIDDEN
    L = len(layer_params)
    if batch_block is None:
        batch_block = B        # on v7x with larger batches: set B//2 -> "parallel" axis uses both TCs
    assert B % batch_block == 0
    nb = B // batch_block
    rows = batch_block * S

    # token embedding (padding_idx=1 row is zero) + positional enc; dropout = id (eval)
    tok = emb_table[token_ids]
    pos = sinusoid_encoding(MAX_LEN, D)[:S]
    x = (tok + pos[None]).astype(jnp.float32).reshape(B * S, D)

    keep = _keep_mask(s_mask, batch_block, S)             # (nb, rows, rows)
    hmask = _head_mask(H, D)                              # (H, 1, D)
    wqkv, bqkv, wo, w1, b1, w2, vec = _pack_layer_params(layer_params)

    kernel = _make_encoder_kernel(rows, D, H, MXU_DTYPE)

    out = pl.pallas_call(
        kernel,
        out_shape=jax.ShapeDtypeStruct((B * S, D), jnp.float32),
        grid_spec=pltpu.PrefetchScalarGridSpec(
            num_scalar_prefetch=0,
            grid=(nb, L),                                 # (batch blocks, layers)
            in_specs=[
                pl.BlockSpec((rows, D), lambda i, l: (i, 0)),              # x
                pl.BlockSpec((None, rows, rows), lambda i, l: (i, 0, 0)),  # keep mask
                pl.BlockSpec((H, 1, D), lambda i, l: (0, 0, 0)),           # head mask
                pl.BlockSpec((None, D, 3 * D), lambda i, l: (l, 0, 0)),    # wqkv
                pl.BlockSpec((None, 1, 3 * D), lambda i, l: (l, 0, 0)),    # bqkv
                pl.BlockSpec((None, D, D), lambda i, l: (l, 0, 0)),        # wo
                pl.BlockSpec((None, D, F), lambda i, l: (l, 0, 0)),        # w1
                pl.BlockSpec((None, 1, F), lambda i, l: (l, 0, 0)),        # b1
                pl.BlockSpec((None, F, D), lambda i, l: (l, 0, 0)),        # w2
                pl.BlockSpec((None, 6, D), lambda i, l: (l, 0, 0)),        # vec
            ],
            out_specs=pl.BlockSpec((rows, D), lambda i, l: (i, 0)),
        ),
        compiler_params=pltpu.CompilerParams(
            dimension_semantics=("parallel", "arbitrary")),
    )(x, keep, hmask, wqkv, bqkv, wo, w1, b1, w2, vec)
    return out.reshape(B, S, D)


# --------------------------- pure-JAX reference -------------------------------
def ref_encoder(token_ids, s_mask, emb_table, layer_params):
    B, S = token_ids.shape
    dh = D_MODEL // N_HEAD
    x = emb_table[token_ids] + sinusoid_encoding(MAX_LEN, D_MODEL)[:S][None]
    for lp in layer_params:
        q = x @ lp["wq"] + lp["bq"]
        k = x @ lp["wk"] + lp["bk"]
        v = x @ lp["wv"] + lp["bv"]
        split = lambda t: t.reshape(B, S, N_HEAD, dh).transpose(0, 2, 1, 3)
        qh, kh, vh = split(q), split(k), split(v)
        s = jnp.einsum("bhqd,bhkd->bhqk", qh, kh) / math.sqrt(dh)
        s = jnp.where(s_mask == 0, -10000.0, s)
        p = jax.nn.softmax(s, axis=-1)
        o = jnp.einsum("bhqk,bhkd->bhqd", p, vh).transpose(0, 2, 1, 3).reshape(B, S, D_MODEL)
        o = o @ lp["wo"] + lp["bo"]
        h1 = x + o
        mu = h1.mean(-1, keepdims=True)
        var = ((h1 - mu) ** 2).mean(-1, keepdims=True)
        h1 = lp["g1"] * (h1 - mu) / jnp.sqrt(var + 1e-12) + lp["be1"]
        f = jnp.maximum(h1 @ lp["w1"] + lp["b1"], 0.0) @ lp["w2"] + lp["b2"]
        h2 = h1 + f
        mu = h2.mean(-1, keepdims=True)
        var = ((h2 - mu) ** 2).mean(-1, keepdims=True)
        x = lp["g2"] * (h2 - mu) / jnp.sqrt(var + 1e-12) + lp["be2"]
    return x


# ------------------------------ parameter init --------------------------------
def init_params(key):
    kit = iter(jax.random.split(key, 8 + N_LAYERS * 12))

    def nrm(shape, scale=0.02):
        return scale * jax.random.normal(next(kit), shape, jnp.float32)

    emb = nrm((ENC_VOC_SIZE, D_MODEL), 1.0)
    emb = emb.at[1].set(0.0)  # nn.Embedding(padding_idx=1)

    layers = []
    for _ in range(N_LAYERS):
        layers.append(dict(
            wq=nrm((D_MODEL, D_MODEL)), bq=nrm((1, D_MODEL)),
            wk=nrm((D_MODEL, D_MODEL)), bk=nrm((1, D_MODEL)),
            wv=nrm((D_MODEL, D_MODEL)), bv=nrm((1, D_MODEL)),
            wo=nrm((D_MODEL, D_MODEL)), bo=nrm((1, D_MODEL)),
            g1=jnp.ones((1, D_MODEL), jnp.float32), be1=jnp.zeros((1, D_MODEL), jnp.float32),
            w1=nrm((D_MODEL, FFN_HIDDEN)), b1=nrm((1, FFN_HIDDEN)),
            w2=nrm((FFN_HIDDEN, D_MODEL)), b2=nrm((1, D_MODEL)),
            g2=jnp.ones((1, D_MODEL), jnp.float32), be2=jnp.zeros((1, D_MODEL), jnp.float32),
        ))
    return emb, layers


# ------------------------------------ main -------------------------------------
if __name__ == "__main__":
    key = jax.random.PRNGKey(0)
    kp, kx = jax.random.split(key)
    emb_table, layer_params = init_params(kp)

    B, S = 2, MAX_LEN
    token_ids = jax.random.randint(kx, (B, S), 0, ENC_VOC_SIZE)
    token_ids = token_ids.at[1, -3:].set(1)                        # some padding tokens
    s_mask = (token_ids != 1).astype(jnp.int32)[:, None, None, :]  # (B, 1, 1, S)

    out = encoder_forward(token_ids, s_mask, emb_table, layer_params)
    out = jax.block_until_ready(out)

    ref = ref_encoder(token_ids, s_mask, emb_table, layer_params)
    assert out.shape == (B, S, D_MODEL)
    assert bool(jnp.all(jnp.isfinite(out)))
    assert jnp.allclose(out, ref, atol=2e-2, rtol=2e-2), float(jnp.max(jnp.abs(out - ref)))
    print("KERNEL_OK")
</pallas_src>

<mosaic_0001>
module attributes {stable_mosaic.version = 11 : i64} {
  func.func @kernel(%arg0: i32, %arg1: i32, %arg2: memref<16x32xf32, #tpu.memory_space<vmem>>, %arg3: memref<1x16x16xf32, #tpu.memory_space<vmem>>, %arg4: memref<4x1x32xf32, #tpu.memory_space<vmem>>, %arg5: memref<1x32x96xbf16, #tpu.memory_space<vmem>>, %arg6: memref<1x1x96xf32, #tpu.memory_space<vmem>>, %arg7: memref<1x32x32xbf16, #tpu.memory_space<vmem>>, %arg8: memref<1x32x64xbf16, #tpu.memory_space<vmem>>, %arg9: memref<1x1x64xf32, #tpu.memory_space<vmem>>, %arg10: memref<1x64x32xbf16, #tpu.memory_space<vmem>>, %arg11: memref<1x6x32xf32, #tpu.memory_space<vmem>>, %arg12: memref<16x32xf32, #tpu.memory_space<vmem>>) attributes {dimension_semantics = [#tpu.dimension_semantics<parallel>, #tpu.dimension_semantics<arbitrary>], iteration_bounds = array<i64: 1, 2>, scalar_prefetch = 0 : i64, scratch_operands = 0 : i64, tpu.core_type = #tpu.core_type<tc>, window_params = [{transform_indices = @transform_0, window_bounds = array<i64: 16, 32>}, {transform_indices = @transform_1, window_bounds = array<i64: 1, 16, 16>}, {pipeline_mode = #tpu.pipeline_mode<synchronous>, transform_indices = @transform_2, window_bounds = array<i64: 4, 1, 32>}, {transform_indices = @transform_3, window_bounds = array<i64: 1, 32, 96>}, {transform_indices = @transform_4, window_bounds = array<i64: 1, 1, 96>}, {transform_indices = @transform_5, window_bounds = array<i64: 1, 32, 32>}, {transform_indices = @transform_6, window_bounds = array<i64: 1, 32, 64>}, {transform_indices = @transform_7, window_bounds = array<i64: 1, 1, 64>}, {transform_indices = @transform_8, window_bounds = array<i64: 1, 64, 32>}, {transform_indices = @transform_9, window_bounds = array<i64: 1, 6, 32>}, {transform_indices = @transform_10, window_bounds = array<i64: 16, 32>}]} {
    %c0_i32 = arith.constant 0 : i32
    %0 = arith.cmpi eq, %arg1, %c0_i32 : i32
    %1 = arith.extui %0 : i1 to i32
    %c0_i32_0 = arith.constant 0 : i32
    %2 = arith.cmpi ne, %1, %c0_i32_0 : i32
    scf.if %2 {
      %c0_52 = arith.constant 0 : index
      %c0_53 = arith.constant 0 : index
      %127 = vector.load %arg2[%c0_52, %c0_53] : memref<16x32xf32, #tpu.memory_space<vmem>>, vector<16x32xf32>
      %c0_54 = arith.constant 0 : index
      %c0_55 = arith.constant 0 : index
      %128 = vector.load %arg12[%c0_54, %c0_55] : memref<16x32xf32, #tpu.memory_space<vmem>>, vector<16x32xf32>
      tpu.vector_store %arg12[%c0_54, %c0_55], %127 {strides = array<i32>} : memref<16x32xf32, #tpu.memory_space<vmem>>, vector<16x32xf32>,
    } else {
    }
    %c0 = arith.constant 0 : index
    %c0_1 = arith.constant 0 : index
    %3 = vector.load %arg12[%c0, %c0_1] : memref<16x32xf32, #tpu.memory_space<vmem>>, vector<16x32xf32>
    %c0_2 = arith.constant 0 : index
    %c0_3 = arith.constant 0 : index
    %c0_4 = arith.constant 0 : index
    %4 = vector.load %arg3[%c0_2, %c0_3, %c0_4] : memref<1x16x16xf32, #tpu.memory_space<vmem>>, vector<1x16x16xf32>
    %5 = vector.shape_cast %4 : vector<1x16x16xf32> to vector<16x16xf32>
    %cst = arith.constant 0.000000e+00 : f32
    %6 = vector.broadcast %cst : f32 to vector<16x16xf32>
    %7 = arith.cmpf ogt, %5, %6 : vector<16x16xf32>
    %c0_5 = arith.constant 0 : index
    %c0_6 = arith.constant 0 : index
    %c0_7 = arith.constant 0 : index
    %8 = vector.load %arg4[%c0_5, %c0_6, %c0_7] : memref<4x1x32xf32, #tpu.memory_space<vmem>>, vector<4x1x32xf32>
    %c0_8 = arith.constant 0 : index
    %c0_9 = arith.constant 0 : index
    %c0_10 = arith.constant 0 : index
    %9 = vector.load %arg11[%c0_8, %c0_9, %c0_10] : memref<1x6x32xf32, #tpu.memory_space<vmem>>, vector<1x6x32xf32>
    %10 = vector.shape_cast %9 : vector<1x6x32xf32> to vector<6x32xf32>
    %11 = vector.extract_strided_slice %10 {offsets = [0, 0], sizes = [1, 32], strides = [1, 1]} : vector<6x32xf32> to vector<1x32xf32>
    %12 = vector.extract_strided_slice %10 {offsets = [1, 0], sizes = [1, 32], strides = [1, 1]} : vector<6x32xf32> to vector<1x32xf32>
    %13 = vector.extract_strided_slice %10 {offsets = [2, 0], sizes = [1, 32], strides = [1, 1]} : vector<6x32xf32> to vector<1x32xf32>
    %14 = vector.extract_strided_slice %10 {offsets = [3, 0], sizes = [1, 32], strides = [1, 1]} : vector<6x32xf32> to vector<1x32xf32>
    %15 = vector.extract_strided_slice %10 {offsets = [4, 0], sizes = [1, 32], strides = [1, 1]} : vector<6x32xf32> to vector<1x32xf32>
    %16 = vector.extract_strided_slice %10 {offsets = [5, 0], sizes = [1, 32], strides = [1, 1]} : vector<6x32xf32> to vector<1x32xf32>
    %17 = arith.truncf %3 : vector<16x32xf32> to vector<16x32xbf16>
    %c0_11 = arith.constant 0 : index
    %c0_12 = arith.constant 0 : index
    %c0_13 = arith.constant 0 : index
    %18 = vector.load %arg5[%c0_11, %c0_12, %c0_13] : memref<1x32x96xbf16, #tpu.memory_space<vmem>>, vector<1x32x96xbf16>
    %19 = vector.shape_cast %18 : vector<1x32x96xbf16> to vector<32x96xbf16>
    %cst_14 = arith.constant dense<0.000000e+00> : vector<16x96xf32>
    %20 = tpu.matmul %17, %19, %cst_14 {dimension_numbers = #tpu.dot_dimension_numbers<[1], [0], [0], [1], [0, 0, 1, 1], [], []>} : vector<16x32xbf16>, vector<32x96xbf16>, vector<16x96xf32> -> vector<16x96xf32>
    %c0_15 = arith.constant 0 : index
    %c0_16 = arith.constant 0 : index
    %c0_17 = arith.constant 0 : index
    %21 = vector.load %arg6[%c0_15, %c0_16, %c0_17] : memref<1x1x96xf32, #tpu.memory_space<vmem>>, vector<1x1x96xf32>
    %22 = vector.shape_cast %21 : vector<1x1x96xf32> to vector<1x96xf32>
    %23 = vector.broadcast %22 : vector<1x96xf32> to vector<16x96xf32>
    %24 = arith.addf %20, %23 : vector<16x96xf32>
    %25 = vector.extract_strided_slice %24 {offsets = [0, 0], sizes = [16, 32], strides = [1, 1]} : vector<16x96xf32> to vector<16x32xf32>
    %26 = vector.extract_strided_slice %24 {offsets = [0, 32], sizes = [16, 32], strides = [1, 1]} : vector<16x96xf32> to vector<16x32xf32>
    %27 = vector.extract_strided_slice %24 {offsets = [0, 64], sizes = [16, 32], strides = [1, 1]} : vector<16x96xf32> to vector<16x32xf32>
    %28 = arith.truncf %25 : vector<16x32xf32> to vector<16x32xbf16>
    %29 = vector.shape_cast %28 : vector<16x32xbf16> to vector<1x16x32xbf16>
    %30 = vector.broadcast %29 : vector<1x16x32xbf16> to vector<4x16x32xbf16>
    %31 = vector.shape_cast %26 : vector<16x32xf32> to vector<1x16x32xf32>
    %32 = vector.broadcast %31 : vector<1x16x32xf32> to vector<4x16x32xf32>
    %33 = vector.broadcast %8 : vector<4x1x32xf32> to vector<4x16x32xf32>
    %34 = arith.mulf %32, %33 : vector<4x16x32xf32>
    %35 = arith.truncf %34 : vector<4x16x32xf32> to vector<4x16x32xbf16>
    %36 = vector.shape_cast %27 : vector<16x32xf32> to vector<1x16x32xf32>
    %37 = vector.broadcast %36 : vector<1x16x32xf32> to vector<4x16x32xf32>
    %38 = vector.broadcast %8 : vector<4x1x32xf32> to vector<4x16x32xf32>
    %39 = arith.mulf %37, %38 : vector<4x16x32xf32>
    %40 = arith.truncf %39 : vector<4x16x32xf32> to vector<4x16x32xbf16>
    "tpu.trace_start"() <{level = 10 : i32, message = "hrd,htd->hrt"}> : () -> ()
    %cst_18 = arith.constant dense<0.000000e+00> : vector<4x16x16xf32>
    %41 = tpu.matmul %30, %35, %cst_18 {dimension_numbers = #tpu.dot_dimension_numbers<[2], [2], [1], [1], [0, 0, 0, 1, 1, 1], [0], [0]>} : vector<4x16x32xbf16>, vector<4x16x32xbf16>, vector<4x16x16xf32> -> vector<4x16x16xf32>
    "tpu.trace_stop"() : () -> ()
    %cst_19 = arith.constant 0.353553385 : f32
    %42 = vector.broadcast %cst_19 : f32 to vector<4x16x16xf32>
    %43 = arith.mulf %41, %42 : vector<4x16x16xf32>
    %44 = vector.shape_cast %7 : vector<16x16xi1> to vector<1x16x16xi1>
    %cst_20 = arith.constant -1.000000e+04 : f32
    %45 = vector.shape_cast %44 : vector<1x16x16xi1> to vector<1x16x16xi1>
    %46 = vector.broadcast %45 : vector<1x16x16xi1> to vector<4x16x16xi1>
    %47 = vector.broadcast %cst_20 : f32 to vector<4x16x16xf32>
    %48 = arith.select %46, %43, %47 : vector<4x16x16xi1>, vector<4x16x16xf32>
    %49 = math.exp %48 : vector<4x16x16xf32>
    %cst_21 = arith.constant dense<0.000000e+00> : vector<4x16xf32>
    %50 = vector.multi_reduction <add>, %49, %cst_21 [2] : vector<4x16x16xf32> to vector<4x16xf32>
    %51 = vector.shape_cast %50 : vector<4x16xf32> to vector<4x16x1xf32>
    %52 = tpu.reciprocal %51 {approx = true} : vector<4x16x1xf32> -> vector<4x16x1xf32>
    %53 = vector.broadcast %52 : vector<4x16x1xf32> to vector<4x16x16xf32>
    %54 = arith.mulf %49, %53 : vector<4x16x16xf32>
    %55 = arith.truncf %54 : vector<4x16x16xf32> to vector<4x16x16xbf16>
    "tpu.trace_start"() <{level = 10 : i32, message = "hrt,htd->hrd"}> : () -> ()
    %cst_22 = arith.constant dense<0.000000e+00> : vector<4x16x32xf32>
    %56 = tpu.matmul %55, %40, %cst_22 {dimension_numbers = #tpu.dot_dimension_numbers<[2], [1], [1], [2], [0, 0, 0, 1, 1, 2], [0], [0]>} : vector<4x16x16xbf16>, vector<4x16x32xbf16>, vector<4x16x32xf32> -> vector<4x16x32xf32>
    "tpu.trace_stop"() : () -> ()
    %cst_23 = arith.constant dense<0.000000e+00> : vector<16x32xf32>
    %57 = vector.multi_reduction <add>, %56, %cst_23 [0] : vector<4x16x32xf32> to vector<16x32xf32>
    %58 = arith.truncf %57 : vector<16x32xf32> to vector<16x32xbf16>
    %c0_24 = arith.constant 0 : index
    %c0_25 = arith.constant 0 : index
    %c0_26 = arith.constant 0 : index
    %59 = vector.load %arg7[%c0_24, %c0_25, %c0_26] : memref<1x32x32xbf16, #tpu.memory_space<vmem>>, vector<1x32x32xbf16>
    %60 = vector.shape_cast %59 : vector<1x32x32xbf16> to vector<32x32xbf16>
    %cst_27 = arith.constant dense<0.000000e+00> : vector<16x32xf32>
    %61 = tpu.matmul %58, %60, %cst_27 {dimension_numbers = #tpu.dot_dimension_numbers<[1], [0], [0], [1], [0, 0, 1, 1], [], []>} : vector<16x32xbf16>, vector<32x32xbf16>, vector<16x32xf32> -> vector<16x32xf32>
    %62 = vector.broadcast %11 : vector<1x32xf32> to vector<16x32xf32>
    %63 = arith.addf %61, %62 : vector<16x32xf32>
    %64 = arith.addf %3, %63 : vector<16x32xf32>
    %cst_28 = arith.constant dense<0.000000e+00> : vector<16xf32>
    %65 = vector.multi_reduction <add>, %64, %cst_28 [1] : vector<16x32xf32> to vector<16xf32>
    %66 = vector.shape_cast %65 : vector<16xf32> to vector<16x1xf32>
    %cst_29 = arith.constant 3.200000e+01 : f32
    %67 = vector.broadcast %cst_29 : f32 to vector<16x1xf32>
    %68 = arith.divf %66, %67 : vector<16x1xf32>
    %69 = arith.mulf %64, %64 : vector<16x32xf32>
    %cst_30 = arith.constant dense<0.000000e+00> : vector<16xf32>
    %70 = vector.multi_reduction <add>, %69, %cst_30 [1] : vector<16x32xf32> to vector<16xf32>
    %71 = vector.shape_cast %70 : vector<16xf32> to vector<16x1xf32>
    %cst_31 = arith.constant 3.200000e+01 : f32
    %72 = vector.broadcast %cst_31 : f32 to vector<16x1xf32>
    %73 = arith.divf %71, %72 : vector<16x1xf32>
    %74 = arith.mulf %68, %68 : vector<16x1xf32>
    %75 = arith.subf %73, %74 : vector<16x1xf32>
    %76 = vector.broadcast %68 : vector<16x1xf32> to vector<16x32xf32>
    %77 = arith.subf %64, %76 : vector<16x32xf32>
    %78 = vector.broadcast %13 : vector<1x32xf32> to vector<16x32xf32>
    %79 = arith.mulf %78, %77 : vector<16x32xf32>
    %cst_32 = arith.constant 9.99999996E-13 : f32
    %80 = vector.broadcast %cst_32 : f32 to vector<16x1xf32>
    %81 = arith.addf %75, %80 : vector<16x1xf32>
    %82 = math.rsqrt %81 : vector<16x1xf32>
    %83 = vector.broadcast %82 : vector<16x1xf32> to vector<16x32xf32>
    %84 = arith.mulf %79, %83 : vector<16x32xf32>
    %85 = vector.broadcast %14 : vector<1x32xf32> to vector<16x32xf32>
    %86 = arith.addf %84, %85 : vector<16x32xf32>
    %87 = arith.truncf %86 : vector<16x32xf32> to vector<16x32xbf16>
    %c0_33 = arith.constant 0 : index
    %c0_34 = arith.constant 0 : index
    %c0_35 = arith.constant 0 : index
    %88 = vector.load %arg8[%c0_33, %c0_34, %c0_35] : memref<1x32x64xbf16, #tpu.memory_space<vmem>>, vector<1x32x64xbf16>
    %89 = vector.shape_cast %88 : vector<1x32x64xbf16> to vector<32x64xbf16>
    %cst_36 = arith.constant dense<0.000000e+00> : vector<16x64xf32>
    %90 = tpu.matmul %87, %89, %cst_36 {dimension_numbers = #tpu.dot_dimension_numbers<[1], [0], [0], [1], [0, 0, 1, 1], [], []>} : vector<16x32xbf16>, vector<32x64xbf16>, vector<16x64xf32> -> vector<16x64xf32>
    %c0_37 = arith.constant 0 : index
    %c0_38 = arith.constant 0 : index
    %c0_39 = arith.constant 0 : index
    %91 = vector.load %arg9[%c0_37, %c0_38, %c0_39] : memref<1x1x64xf32, #tpu.memory_space<vmem>>, vector<1x1x64xf32>
    %92 = vector.shape_cast %91 : vector<1x1x64xf32> to vector<1x64xf32>
    %93 = vector.broadcast %92 : vector<1x64xf32> to vector<16x64xf32>
    %94 = arith.addf %90, %93 : vector<16x64xf32>
    %cst_40 = arith.constant 0.000000e+00 : f32
    %95 = vector.broadcast %cst_40 : f32 to vector<16x64xf32>
    %96 = arith.maximumf %94, %95 : vector<16x64xf32>
    %97 = arith.truncf %96 : vector<16x64xf32> to vector<16x64xbf16>
    %c0_41 = arith.constant 0 : index
    %c0_42 = arith.constant 0 : index
    %c0_43 = arith.constant 0 : index
    %98 = vector.load %arg10[%c0_41, %c0_42, %c0_43] : memref<1x64x32xbf16, #tpu.memory_space<vmem>>, vector<1x64x32xbf16>
    %99 = vector.shape_cast %98 : vector<1x64x32xbf16> to vector<64x32xbf16>
    %cst_44 = arith.constant dense<0.000000e+00> : vector<16x32xf32>
    %100 = tpu.matmul %97, %99, %cst_44 {dimension_numbers = #tpu.dot_dimension_numbers<[1], [0], [0], [1], [0, 0, 1, 1], [], []>} : vector<16x64xbf16>, vector<64x32xbf16>, vector<16x32xf32> -> vector<16x32xf32>
    %101 = vector.broadcast %12 : vector<1x32xf32> to vector<16x32xf32>
    %102 = arith.addf %100, %101 : vector<16x32xf32>
    %103 = arith.addf %86, %102 : vector<16x32xf32>
    %cst_45 = arith.constant dense<0.000000e+00> : vector<16xf32>
    %104 = vector.multi_reduction <add>, %103, %cst_45 [1] : vector<16x32xf32> to vector<16xf32>
    %105 = vector.shape_cast %104 : vector<16xf32> to vector<16x1xf32>
    %cst_46 = arith.constant 3.200000e+01 : f32
    %106 = vector.broadcast %cst_46 : f32 to vector<16x1xf32>
    %107 = arith.divf %105, %106 : vector<16x1xf32>
    %108 = arith.mulf %103, %103 : vector<16x32xf32>
    %cst_47 = arith.constant dense<0.000000e+00> : vector<16xf32>
    %109 = vector.multi_reduction <add>, %108, %cst_47 [1] : vector<16x32xf32> to vector<16xf32>
    %110 = vector.shape_cast %109 : vector<16xf32> to vector<16x1xf32>
    %cst_48 = arith.constant 3.200000e+01 : f32
    %111 = vector.broadcast %cst_48 : f32 to vector<16x1xf32>
    %112 = arith.divf %110, %111 : vector<16x1xf32>
    %113 = arith.mulf %107, %107 : vector<16x1xf32>
    %114 = arith.subf %112, %113 : vector<16x1xf32>
    %115 = vector.broadcast %107 : vector<16x1xf32> to vector<16x32xf32>
    %116 = arith.subf %103, %115 : vector<16x32xf32>
    %117 = vector.broadcast %15 : vector<1x32xf32> to vector<16x32xf32>
    %118 = arith.mulf %117, %116 : vector<16x32xf32>
    %cst_49 = arith.constant 9.99999996E-13 : f32
    %119 = vector.broadcast %cst_49 : f32 to vector<16x1xf32>
    %120 = arith.addf %114, %119 : vector<16x1xf32>
    %121 = math.rsqrt %120 : vector<16x1xf32>
    %122 = vector.broadcast %121 : vector<16x1xf32> to vector<16x32xf32>
    %123 = arith.mulf %118, %122 : vector<16x32xf32>
    %124 = vector.broadcast %16 : vector<1x32xf32> to vector<16x32xf32>
    %125 = arith.addf %123, %124 : vector<16x32xf32>
    %c0_50 = arith.constant 0 : index
    %c0_51 = arith.constant 0 : index
    %126 = vector.load %arg12[%c0_50, %c0_51] : memref<16x32xf32, #tpu.memory_space<vmem>>, vector<16x32xf32>
    tpu.vector_store %arg12[%c0_50, %c0_51], %125 {strides = array<i32>} : memref<16x32xf32, #tpu.memory_space<vmem>>, vector<16x32xf32>,
    return
  }
  func.func @transform_0(%arg0: i32, %arg1: i32) -> (i32, i32) {
    %c0_i32 = arith.constant 0 : i32
    %c0_i32_0 = arith.constant 0 : i32
    return %arg0, %c0_i32 : i32, i32
  }
  func.func @transform_1(%arg0: i32, %arg1: i32) -> (i32, i32, i32) {
    %c0_i32 = arith.constant 0 : i32
    %c0_i32_0 = arith.constant 0 : i32
    %c0_i32_1 = arith.constant 0 : i32
    return %arg0, %c0_i32, %c0_i32_0 : i32, i32, i32
  }
  func.func @transform_2(%arg0: i32, %arg1: i32) -> (i32, i32, i32) {
    %c0_i32 = arith.constant 0 : i32
    %c0_i32_0 = arith.constant 0 : i32
    %c0_i32_1 = arith.constant 0 : i32
    %c0_i32_2 = arith.constant 0 : i32
    return %c0_i32, %c0_i32_0, %c0_i32_1 : i32, i32, i32
  }
  func.func @transform_3(%arg0: i32, %arg1: i32) -> (i32, i32, i32) {
    %c0_i32 = arith.constant 0 : i32
    %c0_i32_0 = arith.constant 0 : i32
    %c0_i32_1 = arith.constant 0 : i32
    return %arg1, %c0_i32, %c0_i32_0 : i32, i32, i32
  }
  func.func @transform_4(%arg0: i32, %arg1: i32) -> (i32, i32, i32) {
    %c0_i32 = arith.constant 0 : i32
    %c0_i32_0 = arith.constant 0 : i32
    %c0_i32_1 = arith.constant 0 : i32
    return %arg1, %c0_i32, %c0_i32_0 : i32, i32, i32
  }
  func.func @transform_5(%arg0: i32, %arg1: i32) -> (i32, i32, i32) {
    %c0_i32 = arith.constant 0 : i32
    %c0_i32_0 = arith.constant 0 : i32
    %c0_i32_1 = arith.constant 0 : i32
    return %arg1, %c0_i32, %c0_i32_0 : i32, i32, i32
  }
  func.func @transform_6(%arg0: i32, %arg1: i32) -> (i32, i32, i32) {
    %c0_i32 = arith.constant 0 : i32
    %c0_i32_0 = arith.constant 0 : i32
    %c0_i32_1 = arith.constant 0 : i32
    return %arg1, %c0_i32, %c0_i32_0 : i32, i32, i32
  }
  func.func @transform_7(%arg0: i32, %arg1: i32) -> (i32, i32, i32) {
    %c0_i32 = arith.constant 0 : i32
    %c0_i32_0 = arith.constant 0 : i32
    %c0_i32_1 = arith.constant 0 : i32
    return %arg1, %c0_i32, %c0_i32_0 : i32, i32, i32
  }
  func.func @transform_8(%arg0: i32, %arg1: i32) -> (i32, i32, i32) {
    %c0_i32 = arith.constant 0 : i32
    %c0_i32_0 = arith.constant 0 : i32
    %c0_i32_1 = arith.constant 0 : i32
    return %arg1, %c0_i32, %c0_i32_0 : i32, i32, i32
  }
  func.func @transform_9(%arg0: i32, %arg1: i32) -> (i32, i32, i32) {
    %c0_i32 = arith.constant 0 : i32
    %c0_i32_0 = arith.constant 0 : i32
    %c0_i32_1 = arith.constant 0 : i32
    return %arg1, %c0_i32, %c0_i32_0 : i32, i32, i32
  }
  func.func @transform_10(%arg0: i32, %arg1: i32) -> (i32, i32) {
    %c0_i32 = arith.constant 0 : i32
    %c0_i32_0 = arith.constant 0 : i32
    return %arg0, %c0_i32 : i32, i32
  }
}

</mosaic_0001>

<bundles_post_ra>
// kernel: tpu_custom_call.1
= control target key start
LH: loop header
LB: loop body
LE: loop exit
PB: predicated region body
PF: predicated region fallthrough
CT: control target
= control target key end

     0   :  { %s2276_s0 = inlined_call_operand.hbm [shape: f32[16,32], index: 0, kind: input, shape index: {}]   ;;  %s2277_s1 = inlined_call_operand.hbm [shape: f32[1,16,16], index: 1, kind: input, shape index: {}]   ;;  %s2278_s2 = inlined_call_operand.hbm [shape: f32[4,1,32], index: 2, kind: input, shape index: {}]   ;;  %s2279_s3 = inlined_call_operand.vmem [shape: bf16[2,32,96], index: 3, kind: input, shape index: {}]   ;;  %s2280_s4 = inlined_call_operand.vmem [shape: f32[2,1,96], index: 4, kind: input, shape index: {}]   ;;  %s2281_s5 = inlined_call_operand.vmem [shape: bf16[2,32,32], index: 5, kind: input, shape index: {}]   ;;  %s2282_s6 = inlined_call_operand.vmem [shape: bf16[2,32,64], index: 6, kind: input, shape index: {}]   ;;  %s2283_s7 = inlined_call_operand.hbm [shape: f32[2,1,64], index: 7, kind: input, shape index: {}]   ;;  %s2284_s8 = inlined_call_operand.vmem [shape: bf16[2,64,32], index: 8, kind: input, shape index: {}]   ;;  %s2285_s9 = inlined_call_operand.vmem [shape: f32[2,6,32], index: 9, kind: input, shape index: {}]   ;;  %s2286_s10 = inlined_call_operand.hbm [shape: f32[16,32], index: 10, kind: output, shape index: {}]  }
   0x1   :  { %2289 = sst [smem:[#allocation16_spill]] %s2276_s0 }
   0x2   :  { %2290 = sst [smem:[#allocation17_spill]] %s2277_s1 }
   0x3   :  { %2291 = sst [smem:[#allocation18_spill]] %s2278_s2 }
   0x4   :  { %2292 = sst [smem:[#allocation19_spill]] %s2283_s7 }
   0x5   :  { %15 = vsyncpa [#allocation3], 0 }
   0x6   :  { %16 = vsyncpa [#allocation6], 0 }
   0x7   :  { %17 = vsyncpa [#allocation9], 0 }
   0x8   :  { %19 = vsyncpa [#allocation9 + $0x1], 0 }
   0x9   :  { %20 = vsyncpa [#allocation4], 0  ;;  %s1951_s13 = smov 0   ;;  %s1953_s14 = smov 0  }
   0xa   :  { %s1955_s15 = smov 0   ;;  %s1957_s16 = smov 0  }
   0xb   :  { %s1959_s17 = smov 0   ;;  %s1961_s18 = smov 0  }
   0xc LB: > { %s2287_s19 = sadd.s32 4294967295, %s1880_s18   ;;  %p1430_p0 = scmp.ge.s32.totalorder %s1880_s18, 1  ;;  %s1880_s18 = sphi %s1961_s18, %s26_s18   ;;  %s1876_s17 = sphi %s1959_s17, %s2310_s17   ;;  %s1872_s16 = sphi %s1957_s16, %s2309_s16   ;;  %s1868_s15 = sphi %s1955_s15, %s2308_s15   ;;  %s1864_s14 = sphi %s1953_s14, %s2307_s14   ;;  %s1860_s13 = sphi %s1951_s13, %s2306_s13  }
   0xd   : > { %p1985_p1 = scmp.eq.s32.totalorder %s2287_s19, 0  ;;  %p324_p2 = scmp.lt.s32.totalorder %s1880_s18, 3 }
   0xe   : > { %s2294_s1 = sld [smem:[#allocation17_spill]]  ;;  %s1882_s25 = smov [#allocation5]  }
   0xf   : > { %p1993_p3 = pnand %p1430_p0, %p324_p2  ;;  %s357_s26 = sshll.u32 %s1882_s25, 4  ;;  %s358_s26 = int_to_ptr.vmem [resolvable:$true] %s357_s26 }
  0x10   : > { %s2297_s0 = sld [smem:[#allocation16_spill]]  ;;  %s1883_s11 = smov 128  }
  0x11   : > { %p1537_p4 = pneg %p1993_p3  ;;  %s1884_s12 = smov 8  }
  0x12   : > { %s1885_s21 = smov [#allocation2]   ;;  %s2298_s2 = sld [smem:[#allocation18_spill]] }
  0x13   : > { %p2001_p5 = pnand %p1537_p4, %p1985_p1  ;;  %s340_s22 = sshll.u32 %s1885_s21, 4  ;;  %s341_s22 = int_to_ptr.vmem [resolvable:$true] %s340_s22 }
  0x14   : > { %s355_s23 = sshll.u32 %s2294_s1, 4  ;;  %s1886_s29 = smov [#allocation7]   ;;  %s356_s23 = int_to_ptr.hbm [resolvable:$true] %s355_s23 }
  0x15   : > { %1543 = dma.hbm_to_vmem [thread:$0]  (!%p2001_p5), %s356_s23, 256, %s358_s26, [#allocation6], %s1883_s11, %s1883_s11, %s1884_s12  }
  0x16   : > { %s338_s30 = sshll.u32 %s2297_s0, 4  ;;  %s371_s0 = sshll.u32 %s1886_s29, 4  ;;  %s339_s30 = int_to_ptr.hbm [resolvable:$true] %s338_s30  ;;  %s372_s0 = int_to_ptr.vmem [resolvable:$true] %s371_s0 }
  0x17   : > { %1540 = dma.hbm_to_vmem [thread:$0]  (!%p2001_p5), %s339_s30, 256, %s341_s22, [#allocation3], %s1883_s11, %s1883_s11, %s1884_s12  }
  0x18   : > { %s369_s28 = sshll.u32 %s2298_s2, 4  ;;  %s1887_s23 = smov 16   ;;  %s370_s28 = int_to_ptr.hbm [resolvable:$true] %s369_s28 }
  0x19   : > { %s1888_s26 = smov 1   ;;  %s35_s19 = sadd.s32 1, %s1876_s17 }
  0x1a   : > { %1546 = dma.hbm_to_vmem [thread:$0]  (!%p2001_p5), %s370_s28, 64, %s372_s0, [#allocation6], %s1887_s23, %s1887_s23, %s1888_s26  }
  0x1b   : > { %p36_p6 = scmp.ge.s32.totalorder %s35_s19, 2  ;;  %s222_s21 = sadd.s32 1, %s1868_s15 }
  0x1c   : > { %p229_p7 = scmp.ne.s32.totalorder %s1868_s15, %s1864_s14  ;;  %p230_p8 = scmp.eq.s32.totalorder %s1880_s18, 0 }
  0x1d   : > { %s2312_s19 = smov (%p36_p6, %s35_s19), 0  ;;  %p235_p10 = scmp.ne.s32.totalorder %s1864_s14, %s1860_s13 }
  0x1e   : > { %2299 = sst [smem:[#allocation15_spill]] %s2312_s19  ;;  %p2024_p9 = por %p230_p8, %p229_p7 }
  0x1f   : > { %s219_s11 = ssub.s32 %s1876_s17, %s2312_s19  ;;  %p1554_p11 = scmp.lt.s32.totalorder %s1880_s18, 2 }
  0x20   : > { %p220_p12 = scmp.eq.s32.totalorder %s219_s11, 0  ;;  %p2035_p13 = por %p1985_p1, %p235_p10 }
  0x21   : > { %s415_s27 = sand.u32 1, %s1868_s15   ;;  %s2302_s7 = sld [smem:[#allocation19_spill]] }
  0x22   : > { %s2045_s28 = scalar_select %p220_p12, %s1868_s15, %s222_s21  }
  0x23   : > { %s418_s23 = scalar_lea.vmem [#allocation8], %s415_s27  ;;  %p1548_p0 = pnand %p1554_p11, %p2024_p9 }
  0x24   : > { %s425_s26 = sshll.u32 %s418_s23, 4  ;;  %s416_s13 = scalar_lea.sflag [#allocation9], %s415_s27  ;;  %s426_s26 = int_to_ptr.vmem [resolvable:$true] %s425_s26 }
  0x25   : > { %449 = sbr.rel (%p1993_p3) target bundleno = 1505 (0x5e1), region = 60 }
  0x27   : > { %s421_s25 = scalar_lea.hbm %s2302_s7, %s1876_s17 }
  0x28   : > { %s423_s29 = sshll.u32 %s421_s25, 4  ;;  %s424_s29 = int_to_ptr.hbm [resolvable:$true] %s423_s29 }
  0x29   : > { %1550 = dma.hbm_to_vmem [thread:$0]  (!%p1548_p0), %s424_s29, 16, %s426_s26, %s416_s13  }
  0x2a   : > { %1843 = dma.done.wait (%p1985_p1), [#allocation3], 256  }
  0x2b   : > { %1845 = vsyncadd (%p1985_p1), [#allocation3], 4294967040 }
  0x2c   : > { %1847 = dma.done.wait (%p1985_p1), [#allocation6], 320  }
  0x2d   : > { %1849 = vsyncadd (%p1985_p1), [#allocation6], 4294966976  ;;  %s466_s21 = sand.u32 1, %s1864_s14  }
  0x2e   : > { %s467_s30 = scalar_lea.sflag [#allocation9], %s466_s21  ;;  %s2060_s11 = scalar_lea.vmem [#allocation8], %s466_s21 }
  0x2f   : > { %1851 = dma.done.wait (%p2035_p13), %s467_s30, 16  }
  0x30   : > { %1853 = vsyncadd (%p2035_p13), %s467_s30, 4294967280  ;;  %p529_p2 = scmp.lt.s32.totalorder %s1872_s16, 1  ;;  %p1448_p1 = scmp.ne.s32.totalorder %s1872_s16, 0 }
  0x32   : > { %s2068_s24 = scalar_select %p529_p2, %s1872_s16, 1 }
  0x34   : > { %s1505_s20 = sshll.u32 %s2068_s24, 4  ;;  %s1508_s2 = sshll.u32 %s2068_s24, 5 }
  0x35   : > { %s533_s23 = scalar_lea.vmem %s2279_s3, %s1505_s20  ;;  %s2081_s13 = scalar_lea.vmem %s2281_s5, %s1505_s20 }
  0x36   : > { %s2086_s1 = scalar_lea.vmem %s2282_s6, %s1505_s20  ;;  %s2092_s27 = scalar_lea.vmem %s2284_s8, %s1508_s2 }
  0x37   : > { %s1447_s12 = sshll.u32 %s2068_s24, 3  ;;  %561 = sbr.rel (%p1448_p1) target bundleno = 63 (0x3f), region = 80 }
  0x38   : > { %s2098_s29 = scalar_lea.vmem %s2285_s9, %s1447_s12 }
  0x3c   : > { %v562_v0 = vld [vmem:[#allocation2] sm:$0xff]  ;;  %vm564_vm0 = vcmask 261120   ;;  %v563_v1 = vld [vmem:[#allocation2 + $0x8] sm:$0xff] }
  0x3d   : > { %565 = vst.msk [vmem:[#allocation10] sm:$0xff] %vm564_vm0, %v562_v0 }
  0x3e   : > { %566 = vst.msk [vmem:[#allocation10 + $0x8] sm:$0xff] %vm564_vm0, %v563_v1 }
  0x3f PF: > { %v1510_v2 = vld [vmem:[%s533_s23 + $0x8] sm:$0xff]  ;;  %v1509_v3 = vld [vmem:[%s533_s23] sm:$0xff]  ;;  %s1889_s2 = smov 32   ;;  %vm599_vm1 = vcmask 261120   ;;  %s2303_s19 = scalar_lea.vmem %s2280_s4, %s2068_s24  ;;  %vm823_vm4 = vcmask 130048   ;;  %vm1178_vm12 = vcmask 523264  }
  0x40   : > { %v1622_v6 = vld [vmem:[#allocation7 + $0x1] ss:$0 sm:$0xff]  ;;  %609 = vmatpush.bf16.msra.mxu0 %v1510_v2  ;;  %v1623_v7 = vld [vmem:[#allocation7] ss:$0 sm:$0xff]  ;;  %v1624_v9 = vld [vmem:[#allocation7 + $0x2] ss:$0 sm:$0xff] }
  0x41   : > { %629 = vrot.lane.b32.xlu0 %v1622_v6, %s1889_s2  ;;  %627 = vrot.lane.b32.xlu1 %v1623_v7, %s1889_s2  ;;  %v1625_v10 = vld [vmem:[#allocation7 + $0x3] ss:$0 sm:$0xff]  ;;  %v1626_v12 = vld [vmem:[%s2303_s19] ss:$0 sm:$0xff]  ;;  %s1890_s24 = smov 96   ;;  %s1891_s20 = smov 64  }
  0x42   : > { %s1264_s0 = sshll.u32 %s2286_s10, 4  ;;  %s2304_s26 = sadd.s32 4294967295, %s1880_s18   ;;  %s1265_s0 = int_to_ptr.hbm [resolvable:$true] %s1264_s0 }
  0x43   : > { %p1558_p3 = scmp.eq.s32.totalorder %s2304_s26, 1  ;;  %s1895_s21 = smov 8  }
  0x44   : > { %v2101_v4 = vld [vmem:[#allocation10] sm:$0xff]  ;;  %610 = vmatpush.bf16.msra.mxu0 %v1509_v3 }
  0x45   : > { %v2103_v5 = vld [vmem:[#allocation10 + $0x8] sm:$0xff] }
  0x46   : > { %v578_v8 = vpack.c.bf16 %v2103_v5, %v2101_v4 }
  0x48   : > { %1457 = vmatmul.msk.bf16.vlgmr.msra.gmra.mxu0 %vm599_vm1, %v578_v8 }
  0x49   : > { %631 = vrot.lane.b32.xlu0 %v1624_v9, %s1889_s2  ;;  %633 = vrot.lane.b32.xlu1 %v1625_v10, %s1889_s2 }
  0xb3   : > { %v628_v11 = vpop.permute.xlu1 %627  ;;  %v630_v14 = vpop.permute.xlu0 %629 }
  0xbb   : > { %v634_v16 = vpop.permute.xlu1 %633  ;;  %v632_v24 = vpop.permute.xlu0 %631 }
  0xc5   : > { %v612_v13 = vpop.f32.mrf.mxu0 }
  0xc6   : > { %v2113_v15 = vadd.f32 %v1626_v12, %v612_v13 }
  0xc8   : > { %v645_v17 = vmul.f32 %v634_v16, %v2113_v15  ;;  %v641_v18 = vmul.f32 %v630_v14, %v2113_v15  ;;  %v639_v19 = vmul.f32 %v628_v11, %v2113_v15  ;;  %v643_v33 = vmul.f32 %v632_v24, %v2113_v15 }
  0xc9   : > { %v617_v51 = vpack.c.bf16 %v2113_v15, %v2113_v15 }
  0xca   : > { %v653_v22 = vpack.c.bf16 %v645_v17, %v645_v17  ;;  %v649_v23 = vpack.c.bf16 %v641_v18, %v641_v18  ;;  %v647_v28 = vpack.c.bf16 %v639_v19, %v639_v19  ;;  %v651_v44 = vpack.c.bf16 %v643_v33, %v643_v33 }
  0xcb   : > { %v685_v53 = vunpack.c.l.b16 %v617_v51 }
  0xcc   : > { %v765_v34 = vunpack.c.l.b16 %v653_v22  ;;  %v717_v35 = vunpack.c.l.b16 %v649_v23  ;;  %v690_v38 = vunpack.c.l.b16 %v647_v28  ;;  %v741_v46 = vunpack.c.l.b16 %v651_v44 }
  0xcd   : > { %v614_v20 = vpop.f32.mrf.mxu0 }
  0xce   : > { %v2118_v21 = vadd.f32 %v1626_v12, %v614_v20 }
  0xd0   : > { %v646_v25 = vmul.f32 %v634_v16, %v2118_v21  ;;  %v642_v26 = vmul.f32 %v630_v14, %v2118_v21  ;;  %v640_v27 = vmul.f32 %v628_v11, %v2118_v21  ;;  %v644_v32 = vmul.f32 %v632_v24, %v2118_v21  ;;  %v569_v11 = vld [vmem:[#allocation5] sm:$0xff] }
  0xd1   : > { %v618_v48 = vpack.c.bf16 %v2118_v21, %v2118_v21  ;;  %vm571_vm2 = vcmp.gt.f32.partialorder %v569_v11, 0.0 }
  0xd2   : > { %v654_v29 = vpack.c.bf16 %v646_v25, %v646_v25  ;;  %v650_v30 = vpack.c.bf16 %v642_v26, %v642_v26  ;;  %v648_v31 = vpack.c.bf16 %v640_v27, %v640_v27  ;;  %v652_v43 = vpack.c.bf16 %v644_v32, %v644_v32  ;;  %v570_v27 = vld [vmem:[#allocation5 + $0x8] sm:$0xff] }
  0xd3   : > { %v686_v52 = vunpack.c.l.b16 %v618_v48  ;;  %vm572_vm3 = vcmp.gt.f32.partialorder %v570_v27, 0.0 }
  0xd4   : > { %v766_v36 = vunpack.c.l.b16 %v654_v29  ;;  %v718_v37 = vunpack.c.l.b16 %v650_v30  ;;  %v691_v39 = vunpack.c.l.b16 %v648_v31  ;;  %v742_v45 = vunpack.c.l.b16 %v652_v43 }
  0xd5   : > { %v687_v54 = vpack.c.b16 %v686_v52, %v685_v53 }
  0xd6   : > { %v767_v40 = vpack.c.b16 %v766_v36, %v765_v34  ;;  %v719_v41 = vpack.c.b16 %v718_v37, %v717_v35  ;;  %v692_v42 = vpack.c.b16 %v691_v39, %v690_v38  ;;  %v743_v47 = vpack.c.b16 %v742_v45, %v741_v46 }
  0xd8   : > { %768 = vrot.lane.b32.xlu1 %v767_v40, %s1890_s24  ;;  %720 = vrot.lane.b32.xlu2 %v719_v41, %s1890_s24 }
  0xd9   : > { %693 = vrot.lane.b32.xlu0 %v692_v42, %s1890_s24 }
  0xe0   : > { %655 = vrot.lane.b32.xlu1 %v1623_v7, %s1891_s20  ;;  %744 = vrot.lane.b32.xlu2 %v743_v47, %s1890_s24 }
  0xe1   : > { %659 = vrot.lane.b32.xlu0 %v1624_v9, %s1891_s20 }
  0xe8   : > { %657 = vrot.lane.b32.xlu2 %v1622_v6, %s1891_s20 }
  0xf0   : > { %661 = vrot.lane.b32.xlu2 %v1625_v10, %s1891_s20 }
 0x132   : > { %v721_v49 = vpop.permute.xlu2 %720 }
 0x133   : > { %v723_v50 = vsel %vm599_vm1, %v721_v49, 0 }
 0x134   : > { %732 = vmatpush.bf16.xpose.msra.mxu2 %v723_v50 }
 0x13a   : > { %v745_v55 = vpop.permute.xlu2 %744 }
 0x13b   : > { %1459 = vmatmul.msk.bf16.vlgmr.msra.gmra.mxu2 %vm599_vm1, %v687_v54  ;;  %v747_v56 = vsel %vm599_vm1, %v745_v55, 0 }
 0x13c   : > { %756 = vmatpush.bf16.xpose.msra.mxu3 %v747_v56 }
 0x142   : > { %v658_v57 = vpop.permute.xlu2 %657 }
 0x143   : > { %v669_v58 = vmul.f32 %v658_v57, %v2113_v15  ;;  %v670_v59 = vmul.f32 %v658_v57, %v2118_v21  ;;  %1460 = vmatmul.msk.bf16.vlgmr.msra.gmra.mxu3 %vm599_vm1, %v687_v54 }
 0x145   : > { %v677_v60 = vpack.c.bf16 %v669_v58, %v669_v58  ;;  %v678_v61 = vpack.c.bf16 %v670_v59, %v670_v59 }
 0x147   : > { %v909_v62 = vunpack.c.l.b16 %v677_v60  ;;  %v910_v63 = vunpack.c.l.b16 %v678_v61 }
 0x149   : > { %v911_v0 = vpack.c.b16 %v910_v63, %v909_v62 }
 0x14a   : > { %v769_v1 = vpop.permute.xlu1 %768 }
 0x14b   : > { %v694_v2 = vpop.permute.xlu0 %693  ;;  %912 = vrot.lane.b32.xlu1 %v911_v0, %s1891_s20  ;;  %v771_v3 = vsel %vm599_vm1, %v769_v1, 0  ;;  %v662_v0 = vpop.permute.xlu2 %661 }
 0x14c   : > { %v699_v6 = vsel %vm599_vm1, %v694_v2, 0  ;;  %780 = vmatpush.bf16.xpose.msrb.mxu0 %v771_v3 }
 0x14d   : > { %708 = vmatpush.bf16.xpose.msra.mxu1 %v699_v6 }
 0x152   : > { %v2144_v7 = vpop.permute.xlu1 %655 }
 0x153   : > { %1461 = vmatmul.msk.bf16.vlgmr.msrb.gmra.mxu0 %vm599_vm1, %v687_v54  ;;  %v667_v61 = vmul.f32 %v2144_v7, %v2113_v15  ;;  %v668_v62 = vmul.f32 %v2144_v7, %v2118_v21  ;;  %v660_v63 = vpop.permute.xlu0 %659 }
 0x154   : > { %1458 = vmatmul.msk.bf16.vlgmr.msra.gmra.mxu1 %vm599_vm1, %v687_v54  ;;  %v671_v1 = vmul.f32 %v660_v63, %v2113_v15  ;;  %v672_v2 = vmul.f32 %v660_v63, %v2118_v21 }
 0x155   : > { %v675_v3 = vpack.c.bf16 %v667_v61, %v667_v61  ;;  %v676_v6 = vpack.c.bf16 %v668_v62, %v668_v62 }
 0x156   : > { %v680_v11 = vpack.c.bf16 %v672_v2, %v672_v2 }
 0x158   : > { %v940_v7 = vunpack.c.l.b16 %v680_v11 }
 0x1bd   : > { %v913_v8 = vpop.permute.xlu1 %912 }
 0x1be   : > { %925 = vmatpush.bf16.msrb.mxu2 %v913_v8  ;;  %v734_v9 = vpop.f32.mrf.mxu2  ;;  %v673_v8 = vmul.f32 %v662_v0, %v2113_v15 }
 0x1bf   : > { %v789_v17 = vmul.f32 0.35355338, %v734_v9  ;;  %v674_v9 = vmul.f32 %v662_v0, %v2118_v21 }
 0x1c1   : > { %v801_v26 = vsel %vm571_vm2, %v789_v17, -10000.0 }
 0x1c2   : > { %v811_v32 = vmul.f32 1.442695, %v801_v26 }
 0x1c6   : > { %v758_v10 = vpop.f32.mrf.mxu3  ;;  %v736_v23 = vpop.f32.mrf.mxu2 }
 0x1c7   : > { %v791_v13 = vmul.f32 0.35355338, %v758_v10  ;;  %v790_v29 = vmul.f32 0.35355338, %v736_v23  ;;  %v679_v10 = vpack.c.bf16 %v671_v1, %v671_v1 }
 0x1c9   : > { %v803_v24 = vsel %vm571_vm2, %v791_v13, -10000.0  ;;  %v802_v38 = vsel %vm572_vm3, %v790_v29, -10000.0  ;;  %v880_v13 = vunpack.c.l.b16 %v676_v6  ;;  %v939_v17 = vunpack.c.l.b16 %v679_v10 }
 0x1ca   : > { %v815_v30 = vmul.f32 1.442695, %v803_v24  ;;  %v813_v46 = vmul.f32 1.442695, %v802_v38 }
 0x1ce   : > { %v760_v28 = vpop.f32.mrf.mxu3 }
 0x1cf   : > { %v792_v33 = vmul.f32 0.35355338, %v760_v28 }
 0x1d0   : > { %v782_v12 = vpop.f32.mrf.mxu0 }
 0x1d1   : > { %v710_v14 = vpop.f32.mrf.mxu1  ;;  %v793_v16 = vmul.f32 0.35355338, %v782_v12  ;;  %v804_v41 = vsel %vm572_vm3, %v792_v33, -10000.0  ;;  %v879_v12 = vunpack.c.l.b16 %v675_v3 }
 0x1d2   : > { %v787_v18 = vmul.f32 0.35355338, %v710_v14  ;;  %v817_v47 = vmul.f32 1.442695, %v804_v41  ;;  %v681_v14 = vpack.c.bf16 %v673_v8, %v673_v8 }
 0x1d3   : > { %v805_v19 = vsel %vm571_vm2, %v793_v16, -10000.0  ;;  %v682_v16 = vpack.c.bf16 %v674_v9, %v674_v9  ;;  %v1511_v9 = vld [vmem:[%s2081_s13] sm:$0xff] }
 0x1d4   : > { %v799_v20 = vsel %vm571_vm2, %v787_v18, -10000.0  ;;  %v819_v22 = vmul.f32 1.442695, %v805_v19  ;;  %v881_v18 = vpack.c.b16 %v880_v13, %v879_v12  ;;  %v969_v19 = vunpack.c.l.b16 %v681_v14 }
 0x1d5   : > { %v807_v25 = vmul.f32 1.442695, %v799_v20  ;;  %v970_v20 = vunpack.c.l.b16 %v682_v16 }
 0x1d6   : > { %1628 = vpow2.f32 %v819_v22  ;;  %v941_v22 = vpack.c.b16 %v940_v7, %v939_v17 }
 0x1d7   : > { %1630 = vpow2.f32 %v807_v25  ;;  %v971_v23 = vpack.c.b16 %v970_v20, %v969_v19 }
 0x1d8   : > { %v784_v31 = vpop.f32.mrf.mxu0  ;;  %1632 = vpow2.f32 %v815_v30 }
 0x1d9   : > { %v712_v34 = vpop.f32.mrf.mxu1  ;;  %v794_v36 = vmul.f32 0.35355338, %v784_v31  ;;  %1634 = vpow2.f32 %v811_v32 }
 0x1da   : > { %v788_v35 = vmul.f32 0.35355338, %v712_v34 }
 0x1db   : > { %v806_v44 = vsel %vm572_vm3, %v794_v36, -10000.0 }
 0x1dc   : > { %v2146_v37 = vpop.eup %1628  ;;  %v800_v39 = vsel %vm572_vm3, %v788_v35, -10000.0  ;;  %v821_v48 = vmul.f32 1.442695, %v806_v44 }
 0x1dd   : > { %v2148_v40 = vpop.eup %1630  ;;  %v809_v42 = vmul.f32 1.442695, %v800_v39  ;;  %v842_v43 = vsel %vm823_vm4, %v2146_v37, 0.0 }
 0x1de   : > { %843 = vadd.xlane.f32.xlu2 %v842_v43  ;;  %v824_v45 = vsel %vm823_vm4, %v2148_v40, 0.0  ;;  %v2154_v49 = vpop.eup %1632 }
 0x1df   : > { %1636 = vpow2.f32 %v809_v42  ;;  %825 = vadd.xlane.f32.xlu0 %v824_v45  ;;  %v2156_v50 = vpop.eup %1634  ;;  %v836_v52 = vsel %vm823_vm4, %v2154_v49, 0.0 }
 0x1e0   : > { %1638 = vpow2.f32 %v813_v46  ;;  %v830_v53 = vsel %vm823_vm4, %v2156_v50, 0.0 }
 0x1e1   : > { %1640 = vpow2.f32 %v817_v47 }
 0x1e2   : > { %1642 = vpow2.f32 %v821_v48 }
 0x1e5   : > { %v2158_v51 = vpop.eup %1636 }
 0x1e6   : > { %837 = vadd.xlane.f32.xlu2 %v836_v52  ;;  %v827_v54 = vsel %vm823_vm4, %v2158_v51, 0.0  ;;  %v2166_v55 = vpop.eup %1638 }
 0x1e7   : > { %831 = vadd.xlane.f32.xlu0 %v830_v53  ;;  %828 = vadd.xlane.f32.xlu1 %v827_v54  ;;  %v1641_v56 = vpop.eup %1640  ;;  %v833_v60 = vsel %vm823_vm4, %v2166_v55, 0.0 }
 0x1e8   : > { %v2168_v57 = vpop.eup %1642  ;;  %v839_v58 = vsel %vm823_vm4, %v1641_v56, 0.0 }
 0x1e9   : > { %v845_v59 = vsel %vm823_vm4, %v2168_v57, 0.0 }
 0x1ee   : > { %840 = vadd.xlane.f32.xlu2 %v839_v58 }
 0x1ef   : > { %846 = vadd.xlane.f32.xlu0 %v845_v59  ;;  %834 = vadd.xlane.f32.xlu1 %v833_v60 }
 0x203   : > { %882 = vrot.lane.b32.xlu0 %v881_v18, %s1891_s20 }
 0x206   : > { %942 = vrot.lane.b32.xlu2 %v941_v22, %s1891_s20 }
 0x208   : > { %972 = vrot.lane.b32.xlu1 %v971_v23, %s1891_s20 }
 0x251   : > { %v844_v15 = vpop.xlane.xlu2 %843 }
 0x252   : > { %v826_v21 = vpop.xlane.xlu0 %825 }
 0x259   : > { %v838_v24 = vpop.xlane.xlu2 %837 }
 0x25a   : > { %v832_v25 = vpop.xlane.xlu0 %831  ;;  %v829_v26 = vpop.xlane.xlu1 %828  ;;  %1644 = vrcp.f32 %v838_v24 }
 0x25b   : > { %1646 = vrcp.f32 %v832_v25 }
 0x25c   : > { %1648 = vrcp.f32 %v829_v26 }
 0x260   : > { %v1645_v28 = vpop.eup %1644 }
 0x261   : > { %v841_v27 = vpop.xlane.xlu2 %840  ;;  %v1647_v30 = vpop.eup %1646  ;;  %v860_v32 = vmul.f32 %v1645_v28, %v2154_v49 }
 0x262   : > { %1650 = vrcp.f32 %v841_v27  ;;  %v835_v29 = vpop.xlane.xlu1 %834  ;;  %v847_v31 = vpop.xlane.xlu0 %846  ;;  %v858_v34 = vmul.f32 %v1647_v30, %v2156_v50 }
 0x263   : > { %1652 = vrcp.f32 %v826_v21  ;;  %v1649_v33 = vpop.eup %1648  ;;  %v868_v38 = vpack.c.bf16 %v860_v32, %v860_v32  ;;  %v2209_v32 = vld [vmem:[%s2098_s29] sm:$0x3f] }
 0x264   : > { %1654 = vrcp.f32 %v835_v29  ;;  %v866_v43 = vpack.c.bf16 %v858_v34, %v858_v34  ;;  %v857_v44 = vmul.f32 %v1649_v33, %v2158_v51  ;;  %v1011_v33 = vperm.slane %v2209_v32, 0 }
 0x265   : > { %1656 = vrcp.f32 %v847_v31  ;;  %v934_v49 = vunpack.c.l.b16 %v868_v38 }
 0x266   : > { %1658 = vrcp.f32 %v844_v15  ;;  %v904_v54 = vunpack.c.l.b16 %v866_v43  ;;  %v865_v58 = vpack.c.bf16 %v857_v44, %v857_v44 }
 0x268   : > { %v1651_v35 = vpop.eup %1650 }
 0x269   : > { %v1653_v36 = vpop.eup %1652  ;;  %v861_v39 = vmul.f32 %v1651_v35, %v1641_v56  ;;  %v943_v41 = vpop.permute.xlu2 %942 }
 0x26a   : > { %v1655_v42 = vpop.eup %1654  ;;  %955 = vmatpush.bf16.msrb.mxu3 %v943_v41  ;;  %v856_v48 = vmul.f32 %v1653_v36, %v2148_v40 }
 0x26b   : > { %v869_v45 = vpack.c.bf16 %v861_v39, %v861_v39  ;;  %v859_v46 = vmul.f32 %v1655_v42, %v2166_v55  ;;  %v1657_v47 = vpop.eup %1656  ;;  %v875_v55 = vunpack.c.l.b16 %v865_v58 }
 0x26c   : > { %v1659_v53 = vpop.eup %1658  ;;  %v863_v60 = vmul.f32 %v1657_v47, %v2168_v57  ;;  %v864_v61 = vpack.c.bf16 %v856_v48, %v856_v48  ;;  %v1892_v47 = vmov 32.0  }
 0x26d   : > { %v935_v50 = vunpack.c.l.b16 %v869_v45  ;;  %v867_v52 = vpack.c.bf16 %v859_v46, %v859_v46  ;;  %v862_v51 = vmul.f32 %v1659_v53, %v2146_v37  ;;  %v1512_v37 = vld [vmem:[%s2081_s13 + $0x8] sm:$0xff]  ;;  %1660 = vrcp.f32 %v1892_v47  ;;  %s1894_s13 = smov 128  }
 0x26e   : > { %v871_v40 = vpack.c.bf16 %v863_v60, %v863_v60  ;;  %v874_v63 = vunpack.c.l.b16 %v864_v61 }
 0x26f   : > { %v905_v59 = vunpack.c.l.b16 %v867_v52  ;;  %v936_v56 = vpack.c.b16 %v935_v50, %v934_v49  ;;  %v870_v1 = vpack.c.bf16 %v862_v51, %v862_v51  ;;  %v1513_v51 = vld [vmem:[%s2086_s1] sm:$0xff] }
 0x270   : > { %v876_v2 = vpack.c.b16 %v875_v55, %v874_v63  ;;  %v965_v3 = vunpack.c.l.b16 %v871_v40 }
 0x271   : > { %v906_v62 = vpack.c.b16 %v905_v59, %v904_v54  ;;  %1464 = vmatmul.msk.bf16.vlgmr.msrb.gmra.mxu3 %vm823_vm4, %v936_v56  ;;  %v964_v57 = vunpack.c.l.b16 %v870_v1  ;;  %v1514_v59 = vld [vmem:[%s2086_s1 + $0x8] sm:$0xff]  ;;  %s1893_s1 = smov [#allocation10]  }
 0x272   : > { %1134 = vmatpush.bf16.msra.mxu2 %v1514_v59 }
 0x273   : > { %1463 = vmatmul.msk.bf16.vlgmr.msrb.gmra.mxu2 %vm823_vm4, %v906_v62  ;;  %v966_v8 = vpack.c.b16 %v965_v3, %v964_v57  ;;  %v1661_v48 = vpop.eup %1660 }
 0x274   : > { %v1050_v49 = vmul.f32 32.0, %v1661_v48  ;;  %vm1054_vm5 = vweird.f32 %v1661_v48 }
 0x275   : > { %v883_v0 = vpop.permute.xlu0 %882 }
 0x276   : > { %895 = vmatpush.bf16.msrb.mxu1 %v883_v0  ;;  %v1051_v50 = vsub.f32 1.0, %v1050_v49  ;;  %1135 = vmatpush.bf16.msra.mxu2 %v1513_v51 }
 0x278   : > { %v1052_v52 = vmul.f32 %v1661_v48, %v1051_v50 }
 0x279   : > { %1462 = vmatmul.msk.bf16.vlgmr.msrb.gmra.mxu1 %vm823_vm4, %v876_v2 }
 0x27a   : > { %v973_v6 = vpop.permute.xlu1 %972  ;;  %1033 = vmatpush.bf16.msra.mxu1 %v1512_v37  ;;  %v1053_v53 = vadd.f32 %v1661_v48, %v1052_v52 }
 0x27b   : > { %985 = vmatpush.bf16.msra.mxu0 %v973_v6 }
 0x27c   : > { %v2223_v54 = vsel %vm1054_vm5, %v1661_v48, %v1053_v53 }
 0x27e   : > { %1465 = vmatmul.msk.bf16.vlgmr.msra.gmra.mxu0 %vm823_vm4, %v966_v8  ;;  %1034 = vmatpush.bf16.msra.mxu1 %v1511_v9 }
 0x2f4   : > { %v957_v10 = vpop.f32.mrf.mxu3 }
 0x2f5   : > { %v995_v23 = vsel %vm599_vm1, %v957_v10, 0.0 }
 0x2f6   : > { %v927_v11 = vpop.f32.mrf.mxu2  ;;  %v897_v12 = vpop.f32.mrf.mxu1 }
 0x2f7   : > { %v993_v13 = vsel %vm599_vm1, %v927_v11, 0.0  ;;  %v992_v14 = vsel %vm599_vm1, %v897_v12, 0.0 }
 0x2f8   : > { %v994_v17 = vadd.f32 %v993_v13, %v992_v14 }
 0x2fa   : > { %v996_v21 = vadd.f32 %v995_v23, %v994_v17 }
 0x2fb   : > { %v987_v16 = vpop.f32.mrf.mxu0 }
 0x2fc   : > { %v959_v7 = vpop.f32.mrf.mxu3  ;;  %v997_v25 = vsel %vm599_vm1, %v987_v16, 0.0  ;;  %v1074_v16 = vperm.slane %v2209_v32, 2 }
 0x2fd   : > { %v1002_v24 = vsel %vm599_vm1, %v959_v7, 0.0  ;;  %v998_v29 = vadd.f32 %v997_v25, %v996_v21 }
 0x2fe   : > { %v929_v18 = vpop.f32.mrf.mxu2  ;;  %v899_v19 = vpop.f32.mrf.mxu1 }
 0x2ff   : > { %v1000_v20 = vsel %vm599_vm1, %v929_v18, 0.0  ;;  %v999_v22 = vsel %vm599_vm1, %v899_v19, 0.0 }
 0x300   : > { %v1001_v15 = vadd.f32 %v1000_v20, %v999_v22 }
 0x302   : > { %v1003_v26 = vadd.f32 %v1002_v24, %v1001_v15  ;;  %v1101_v15 = vperm.slane %v2209_v32, 3 }
 0x303   : > { %v989_v27 = vpop.f32.mrf.mxu0 }
 0x304   : > { %v1004_v28 = vsel %vm599_vm1, %v989_v27, 0.0 }
 0x305   : > { %v1005_v30 = vadd.f32 %v1004_v28, %v1003_v26 }
 0x307   : > { %v1006_v31 = vpack.c.bf16 %v1005_v30, %v998_v29  ;;  %v1518_v30 = vld [vmem:[%s2092_s27 + $0x18] sm:$0xff] }
 0x308   : > { %1186 = vmatpush.bf16.msra.mxu3 %v1518_v30 }
 0x309   : > { %1474 = vmatmul.msk.bf16.vlgmr.msra.gmra.mxu1 %vm599_vm1, %v1006_v31  ;;  %v1517_v31 = vld [vmem:[%s2092_s27 + $0x10] sm:$0xff] }
 0x30c   : > { %1187 = vmatpush.bf16.msra.mxu3 %v1517_v31 }
 0x386   : > { %v1036_v34 = vpop.f32.mrf.mxu1 }
 0x387   : > { %v1037_v35 = vadd.f32 %v1036_v34, %v1011_v33  ;;  %v1515_v34 = vld [vmem:[%s2092_s27] sm:$0xff] }
 0x389   : > { %v2213_v36 = vadd.f32 %v1037_v35, %v2101_v4 }
 0x38b   : > { %v1043_v38 = vsel %vm599_vm1, %v2213_v36, 0.0  ;;  %v1058_v39 = vmul.f32 %v2213_v36, %v2213_v36 }
 0x38c   : > { %1044 = vadd.xlane.f32.xlu0 %v1043_v38 }
 0x38d   : > { %v1060_v41 = vsel %vm599_vm1, %v1058_v39, 0.0 }
 0x38e   : > { %v1038_v42 = vpop.f32.mrf.mxu1  ;;  %1061 = vadd.xlane.f32.xlu1 %v1060_v41 }
 0x38f   : > { %v1039_v43 = vadd.f32 %v1038_v42, %v1011_v33  ;;  %v1516_v33 = vld [vmem:[%s2092_s27 + $0x8] sm:$0xff] }
 0x390   : > { %1188 = vmatpush.bf16.msra.mxu3 %v1516_v33 }
 0x391   : > { %v1042_v44 = vadd.f32 %v1039_v43, %v2103_v5 }
 0x393   : > { %v1046_v45 = vsel %vm599_vm1, %v1042_v44, 0.0  ;;  %v1059_v46 = vmul.f32 %v1042_v44, %v1042_v44 }
 0x394   : > { %1047 = vadd.xlane.f32.xlu2 %v1046_v45  ;;  %1189 = vmatpush.bf16.msra.mxu3 %v1515_v34  ;;  %v1153_v45 = vperm.slane %v2209_v32, 1 }
 0x395   : > { %v1063_v4 = vsel %vm599_vm1, %v1059_v46, 0.0 }
 0x396   : > { %1064 = vadd.xlane.f32.xlu0 %v1063_v4 }
 0x3ff   : > { %v1045_v5 = vpop.xlane.xlu0 %1044 }
 0x400   : > { %v1056_v58 = vmul.f32 %v2223_v54, %v1045_v5 }
 0x401   : > { %v1062_v56 = vpop.xlane.xlu1 %1061 }
 0x402   : > { %v1068_v60 = vmul.f32 %v1056_v58, %v1056_v58  ;;  %v1066_v61 = vmul.f32 %v1062_v56, %v2223_v54  ;;  %v1072_v17 = vsub.f32 %v2213_v36, %v1056_v58  ;;  %v1627_v36 = vld [vmem:[%s2060_s11] ss:$0 sm:$0xff]  ;;  %s1262_s11 = sshll.u32 %s1893_s1, 4  ;;  %s1263_s11 = int_to_ptr.vmem [resolvable:$true] %s1262_s11 }
 0x404   : > { %v1070_v62 = vsub.f32 %v1066_v61, %v1068_v60  ;;  %v1075_v22 = vmul.f32 %v1074_v16, %v1072_v17 }
 0x406   : > { %v1077_v55 = vadd.f32 1e-12, %v1070_v62 }
 0x407   : > { %v1048_v40 = vpop.xlane.xlu2 %1047 }
 0x408   : > { %1662 = vrsqrt.f32 %v1077_v55  ;;  %v1057_v63 = vmul.f32 %v2223_v54, %v1048_v40  ;;  %vm1085_vm7 = vweird.f32 %v1077_v55 }
 0x409   : > { %v1065_v0 = vpop.xlane.xlu0 %1064 }
 0x40a   : > { %v1069_v1 = vmul.f32 %v1057_v63, %v1057_v63  ;;  %v1067_v2 = vmul.f32 %v1065_v0, %v2223_v54  ;;  %v1073_v18 = vsub.f32 %v1042_v44, %v1057_v63 }
 0x40c   : > { %v1071_v3 = vsub.f32 %v1067_v2, %v1069_v1  ;;  %v1076_v24 = vmul.f32 %v1074_v16, %v1073_v18 }
 0x40e   : > { %v1663_v57 = vpop.eup %1662  ;;  %v1078_v6 = vadd.f32 1e-12, %v1071_v3 }
 0x40f   : > { %v1080_v8 = vmul.f32 %v1663_v57, %v1077_v55  ;;  %vm1086_vm6 = vweird.f32 %v1663_v57 }
 0x410   : > { %1664 = vrsqrt.f32 %v1078_v6  ;;  %vm1087_vm8 = vmor %vm1085_vm7, %vm1086_vm6  ;;  %vm1095_vm10 = vweird.f32 %v1078_v6 }
 0x411   : > { %v1081_v37 = vmul.f32 %v1663_v57, %v1080_v8 }
 0x413   : > { %v1082_v9 = vmul.f32 0.5, %v1081_v37 }
 0x415   : > { %v1083_v10 = vsub.f32 1.5, %v1082_v9 }
 0x416   : > { %v1665_v11 = vpop.eup %1664 }
 0x417   : > { %v1090_v12 = vmul.f32 %v1665_v11, %v1078_v6  ;;  %v1084_v13 = vmul.f32 %v1663_v57, %v1083_v10  ;;  %vm1096_vm9 = vweird.f32 %v1665_v11 }
 0x418   : > { %vm1097_vm11 = vmor %vm1095_vm10, %vm1096_vm9 }
 0x419   : > { %v1091_v14 = vmul.f32 %v1665_v11, %v1090_v12  ;;  %v1088_v19 = vsel %vm1087_vm8, %v1663_v57, %v1084_v13  ;;  %v1222_v12 = vperm.slane %v2209_v32, 4 }
 0x41a   : > { %v1099_v21 = vmul.f32 %v1088_v19, %v1075_v22  ;;  %v1249_v19 = vperm.slane %v2209_v32, 5 }
 0x41b   : > { %v1092_v7 = vmul.f32 0.5, %v1091_v14 }
 0x41c   : > { %v1102_v27 = vadd.f32 %v1101_v15, %v1099_v21 }
 0x41d   : > { %v1093_v20 = vsub.f32 1.5, %v1092_v7 }
 0x41f   : > { %v1094_v23 = vmul.f32 %v1665_v11, %v1093_v20 }
 0x421   : > { %v1098_v25 = vsel %vm1097_vm11, %v1665_v11, %v1094_v23 }
 0x422   : > { %v1100_v26 = vmul.f32 %v1098_v25, %v1076_v24 }
 0x424   : > { %v1103_v28 = vadd.f32 %v1101_v15, %v1100_v26 }
 0x426   : > { %v1104_v29 = vpack.c.bf16 %v1103_v28, %v1102_v27 }
 0x428   : > { %1483 = vmatmul.msk.bf16.vlgmr.msra.gmra.mxu2 %vm599_vm1, %v1104_v29 }
 0x4ab   : > { %v1137_v35 = vpop.f32.mrf.mxu2 }
 0x4ac   : > { %v1138_v38 = vadd.f32 %v1627_v36, %v1137_v35 }
 0x4ae   : > { %v1142_v42 = vmax.f32 %v1138_v38, 0.0 }
 0x4b3   : > { %v1139_v39 = vpop.f32.mrf.mxu2 }
 0x4b4   : > { %v1140_v41 = vadd.f32 %v1627_v36, %v1139_v39 }
 0x4b6   : > { %v1143_v43 = vmax.f32 %v1140_v41, 0.0 }
 0x4b8   : > { %v1144_v44 = vpack.c.bf16 %v1143_v43, %v1142_v42 }
 0x4ba   : > { %1500 = vmatmul.msk.bf16.vlgmr.msra.gmra.mxu3 %vm1178_vm12, %v1144_v44 }
 0x53d   : > { %v1191_v46 = vpop.f32.mrf.mxu3 }
 0x53e   : > { %v1192_v4 = vadd.f32 %v1191_v46, %v1153_v45 }
 0x540   : > { %v1196_v47 = vadd.f32 %v1192_v4, %v1102_v27 }
 0x542   : > { %v1198_v48 = vsel %vm599_vm1, %v1196_v47, 0.0  ;;  %v1206_v49 = vmul.f32 %v1196_v47, %v1196_v47 }
 0x543   : > { %1199 = vadd.xlane.f32.xlu2 %v1198_v48 }
 0x544   : > { %v1208_v50 = vsel %vm599_vm1, %v1206_v49, 0.0 }
 0x545   : > { %v1193_v52 = vpop.f32.mrf.mxu3  ;;  %1209 = vadd.xlane.f32.xlu0 %v1208_v50 }
 0x546   : > { %v1194_v53 = vadd.f32 %v1193_v52, %v1153_v45 }
 0x548   : > { %v1197_v5 = vadd.f32 %v1194_v53, %v1103_v28 }
 0x54a   : > { %v1201_v58 = vsel %vm599_vm1, %v1197_v5, 0.0  ;;  %v1207_v59 = vmul.f32 %v1197_v5, %v1197_v5 }
 0x54b   : > { %1202 = vadd.xlane.f32.xlu1 %v1201_v58 }
 0x54c   : > { %v1211_v56 = vsel %vm599_vm1, %v1207_v59, 0.0 }
 0x54d   : > { %1212 = vadd.xlane.f32.xlu2 %v1211_v56 }
 0x5b6   : > { %v1200_v60 = vpop.xlane.xlu2 %1199 }
 0x5b7   : > { %v1204_v61 = vmul.f32 %v1200_v60, %v2223_v54 }
 0x5b8   : > { %v1210_v62 = vpop.xlane.xlu0 %1209 }
 0x5b9   : > { %v1216_v51 = vmul.f32 %v1204_v61, %v1204_v61  ;;  %v1214_v55 = vmul.f32 %v1210_v62, %v2223_v54  ;;  %v1220_v13 = vsub.f32 %v1196_v47, %v1204_v61 }
 0x5bb   : > { %v1218_v40 = vsub.f32 %v1214_v55, %v1216_v51  ;;  %v1223_v18 = vmul.f32 %v1222_v12, %v1220_v13 }
 0x5bd   : > { %v1225_v63 = vadd.f32 1e-12, %v1218_v40 }
 0x5be   : > { %v1203_v0 = vpop.xlane.xlu1 %1202 }
 0x5bf   : > { %1666 = vrsqrt.f32 %v1225_v63  ;;  %v1205_v1 = vmul.f32 %v1203_v0, %v2223_v54  ;;  %vm1233_vm14 = vweird.f32 %v1225_v63 }
 0x5c0   : > { %v1213_v2 = vpop.xlane.xlu2 %1212 }
 0x5c1   : > { %v1217_v3 = vmul.f32 %v1205_v1, %v1205_v1  ;;  %v1215_v57 = vmul.f32 %v1213_v2, %v2223_v54  ;;  %v1221_v21 = vsub.f32 %v1197_v5, %v1205_v1 }
 0x5c3   : > { %v1219_v6 = vsub.f32 %v1215_v57, %v1217_v3  ;;  %v1224_v26 = vmul.f32 %v1222_v12, %v1221_v21 }
 0x5c5   : > { %v1667_v8 = vpop.eup %1666  ;;  %v1226_v37 = vadd.f32 1e-12, %v1219_v6 }
 0x5c6   : > { %v1228_v9 = vmul.f32 %v1667_v8, %v1225_v63  ;;  %vm1234_vm13 = vweird.f32 %v1667_v8 }
 0x5c7   : > { %1668 = vrsqrt.f32 %v1226_v37  ;;  %vm1235_vm15 = vmor %vm1233_vm14, %vm1234_vm13  ;;  %vm1243_vm2 = vweird.f32 %v1226_v37 }
 0x5c8   : > { %v1229_v10 = vmul.f32 %v1667_v8, %v1228_v9 }
 0x5ca   : > { %v1230_v11 = vmul.f32 0.5, %v1229_v10 }
 0x5cc   : > { %v1231_v14 = vsub.f32 1.5, %v1230_v11 }
 0x5cd   : > { %v1669_v16 = vpop.eup %1668 }
 0x5ce   : > { %v1232_v17 = vmul.f32 %v1667_v8, %v1231_v14  ;;  %v1238_v7 = vmul.f32 %v1669_v16, %v1226_v37  ;;  %vm1244_vm0 = vweird.f32 %v1669_v16 }
 0x5cf   : > { %vm1245_vm3 = vmor %vm1243_vm2, %vm1244_vm0 }
 0x5d0   : > { %v1236_v54 = vsel %vm1235_vm15, %v1667_v8, %v1232_v17  ;;  %v1239_v20 = vmul.f32 %v1669_v16, %v1238_v7 }
 0x5d1   : > { %v1247_v22 = vmul.f32 %v1236_v54, %v1223_v18 }
 0x5d2   : > { %v1240_v23 = vmul.f32 0.5, %v1239_v20 }
 0x5d3   : > { %v1250_v15 = vadd.f32 %v1249_v19, %v1247_v22 }
 0x5d4   : > { %v1241_v24 = vsub.f32 1.5, %v1240_v23 }
 0x5d5   : > { %1252 = vst.msk [vmem:[#allocation10] sm:$0xff] %vm599_vm1, %v1250_v15 }
 0x5d6   : > { %v1242_v25 = vmul.f32 %v1669_v16, %v1241_v24 }
 0x5d8   : > { %v1246_v32 = vsel %vm1245_vm3, %v1669_v16, %v1242_v25 }
 0x5d9   : > { %v1248_v27 = vmul.f32 %v1246_v32, %v1224_v26 }
 0x5db   : > { %v1251_v28 = vadd.f32 %v1249_v19, %v1248_v27 }
 0x5dd   : > { %1253 = vst.msk [vmem:[#allocation10 + $0x8] sm:$0xff] %vm599_vm1, %v1251_v28 }
 0x5de   : > { %1534 = dma.vmem_to_hbm [thread:$0]  (%p1558_p3), %s1263_s11, 256, %s1265_s0, [#allocation4], %s1894_s13, %s1894_s13, %s1895_s21  }
 0x5df   : > { %1855 = dma.done.wait (%p1558_p3), [#allocation4], 256  }
 0x5e0   : > { %1857 = vsyncadd (%p1558_p3), [#allocation4], 4294967040 }
 0x5e1 PF: > { %s26_s18 = sadd.s32 1, %s1880_s18   ;;  %s2305_s30 = sld [smem:[#allocation15_spill]] }
 0x5e2   : > { %p23_p4 = scmp.ge.s32.totalorder %s26_s18, 4   ;;  %s2306_s13 = smov %s1864_s14 }
 0x5e3   : > { %s2307_s14 = smov %s1868_s15  ;;  %s2308_s15 = smov %s2045_s28 }
 0x5e4   : > { %s2309_s16 = smov %s1876_s17  ;;  %25 = sbr.rel (!%p23_p4) target bundleno = 12 (0xc), region = 135 }
 0x5e7   : > { %s2310_s17 = smov %s2305_s30 }
 0x5e9   :  { %1281 = vsyncpa [#allocation3], 1 }
 0x5ea   :  { %1283 = vsyncpa [#allocation3 + $0x1], 1 }
 0x5eb   :  { %1284 = vsyncpa [#allocation6], 1 }
 0x5ec   :  { %1285 = vsyncpa [#allocation9], 1 }
 0x5ed   :  { %1287 = vsyncpa [#allocation9 + $0x1], 1 }
 0x5ee   :  { %1288 = vsyncpa [#allocation4], 1 }
 0x5ef   :  { %1290 = vsyncpa [#allocation4 + $0x1], 1 }

</bundles_post_ra>
